<compile_context>
chip_gen: v7x
topology: tpu7x:2x2x1
jax: 0.10.0
libtpu: 0.0.40
codegen_flags: <defaults>
</compile_context>

<pallas_src>
import math

import jax
import jax.numpy as jnp
from jax.experimental import pallas as pl
from jax.experimental.pallas import tpu as pltpu

NUM_CHANNELS = 128          # num_channels of the module (must be even here)
MAX_PERIOD = 10000.0
FLIP_SIN_TO_COS = True      # Timesteps default
DOWNSCALE_FREQ_SHIFT = 0.0  # Timesteps default
SCALE = 1.0
P = 0.5                     # 0 < p < 1 so the mask-driven branch is taken

TILE_N_MAX = 2048           # rows per tile: 2048 x 128 x 4B = 1 MiB out block


def _round_up(x, m):
    return ((x + m - 1) // m) * m


def _emb_kernel(t_ref, mask_ref, const_ref, out_ref):
    """t_ref/mask_ref: (TILE_N, 1); const_ref: (3, C); out_ref: (TILE_N, C).

    const_ref rows: 0 = full-width freqs, 1 = phase (pi/2 / 0), 2 = unknown_token.
    """
    freqs = const_ref[0:1, :]                                # (1, C)
    phase = const_ref[1:2, :]                                # (1, C)
    token = const_ref[2:3, :]                                # (1, C)
    # Single full-width sin: cos-half carries phase pi/2, sin-half phase 0.
    arg = t_ref[...] * freqs + phase                         # (TILE_N, C) f32
    emb = jnp.sin(arg)
    mask = mask_ref[...] != 0                                # (TILE_N, 1) bool
    out_ref[...] = jnp.where(mask, token, emb)               # broadcast (1,C)/(TILE_N,1)


def _build_consts(unknown_token):
    """Hoisted (3, C) constant table: [freqs | phase | unknown_token]."""
    C = unknown_token.shape[-1]
    half = C // 2
    exponent = (-math.log(MAX_PERIOD)
                * jnp.arange(half, dtype=jnp.float32)
                / (half - DOWNSCALE_FREQ_SHIFT))
    freqs = jnp.exp(exponent) * SCALE                        # (half,)
    freqs_full = jnp.concatenate([freqs, freqs])             # (C,)
    if FLIP_SIN_TO_COS:
        # output layout: [cos(arg) | sin(arg)]  ->  phase = [pi/2]*half + [0]*half
        phase = jnp.concatenate([
            jnp.full((half,), 0.5 * math.pi, dtype=jnp.float32),
            jnp.zeros((half,), dtype=jnp.float32)])
    else:
        # output layout: [sin(arg) | cos(arg)]
        phase = jnp.concatenate([
            jnp.zeros((half,), dtype=jnp.float32),
            jnp.full((half,), 0.5 * math.pi, dtype=jnp.float32)])
    token = unknown_token.reshape(C).astype(jnp.float32)
    return jnp.stack([freqs_full, phase, token], axis=0)     # (3, C)


def stochastic_unknown_timesteps(timesteps, mask, unknown_token):
    """timesteps: (B,T) f32, mask: (B,T) bool, unknown_token: (1,C) f32 -> (B,T,C) f32."""
    B, T = timesteps.shape
    N = B * T
    C = unknown_token.shape[-1]

    consts = _build_consts(unknown_token)                    # (3, C)
    t2 = timesteps.reshape(N, 1).astype(jnp.float32)         # metadata-only reshape
    m2 = mask.reshape(N, 1).astype(jnp.int32)

    # Biggest tile that fits comfortably; Pallas handles the final partial
    # block (padded reads, masked writes), so no wrapper padding / re-slicing.
    tile = min(TILE_N_MAX, _round_up(N, 8))
    grid = (pl.cdiv(N, tile),)

    out = pl.pallas_call(
        _emb_kernel,
        out_shape=jax.ShapeDtypeStruct((N, C), jnp.float32),
        grid=grid,
        in_specs=[
            pl.BlockSpec((tile, 1), lambda i: (i, 0)),       # timesteps
            pl.BlockSpec((tile, 1), lambda i: (i, 0)),       # mask
            pl.BlockSpec((3, C), lambda i: (0, 0)),          # constants (resident)
        ],
        out_specs=pl.BlockSpec((tile, C), lambda i: (i, 0)),
        compiler_params=pltpu.CompilerParams(
            dimension_semantics=("parallel",)),
        cost_estimate=pl.CostEstimate(
            flops=3 * N * C,
            transcendentals=N * C,
            bytes_accessed=N * C * 4 + N * 8 + 3 * C * 4),
    )(t2, m2, consts)

    return out.reshape(B, T, C)


def _reference(timesteps, mask, unknown_token):
    """Pure-JAX transcription of the PyTorch forward (eval, mask provided)."""
    half = NUM_CHANNELS // 2
    exponent = (-math.log(MAX_PERIOD)
                * jnp.arange(half, dtype=jnp.float32)
                / (half - DOWNSCALE_FREQ_SHIFT))
    freqs = jnp.exp(exponent)
    emb = timesteps[..., None].astype(jnp.float32) * freqs
    emb = SCALE * emb
    emb = jnp.concatenate([jnp.sin(emb), jnp.cos(emb)], axis=-1)
    if FLIP_SIN_TO_COS:
        emb = jnp.concatenate([emb[..., half:], emb[..., :half]], axis=-1)
    return jnp.where(mask[..., None], unknown_token, emb)


if __name__ == "__main__":
    key = jax.random.PRNGKey(0)
    k_t, k_m, k_tok = jax.random.split(key, 3)

    # Deterministic stand-in for nn.Parameter(torch.randn(1, num_channels))
    unknown_token = jax.random.normal(k_tok, (1, NUM_CHANNELS), dtype=jnp.float32)

    # --- small shape (single tile) ---
    B, T = 2, 8
    timesteps = jax.random.randint(k_t, (B, T), 0, 1000).astype(jnp.float32)
    mask = jax.random.uniform(k_m, (B, T)) < P            # "known/unknown" mask

    out = stochastic_unknown_timesteps(timesteps, mask, unknown_token)
    out = jax.block_until_ready(out)

    ref = _reference(timesteps, mask, unknown_token)
    assert out.shape == (B, T, NUM_CHANNELS) and out.dtype == jnp.float32
    # sin(x + pi/2) vs cos(x): identical mathematically; allow a few ULPs of the
    # large (~1e3 rad) argument's rounding.
    assert jnp.allclose(out, ref, atol=2e-4, rtol=2e-4), "mismatch vs reference (small)"

    # --- moderate shape: exercises multi-tile grid + masked partial last block
    #     (N = 2200 -> tile 2048, grid 2, last block 152 rows) ---
    B2, T2 = 2, 1100
    k_t2, k_m2 = jax.random.split(jax.random.PRNGKey(1))
    timesteps2 = jax.random.randint(k_t2, (B2, T2), 0, 1000).astype(jnp.float32)
    mask2 = jax.random.uniform(k_m2, (B2, T2)) < P
    out2 = jax.block_until_ready(
        stochastic_unknown_timesteps(timesteps2, mask2, unknown_token))
    ref2 = _reference(timesteps2, mask2, unknown_token)
    assert out2.shape == (B2, T2, NUM_CHANNELS)
    assert jnp.allclose(out2, ref2, atol=2e-4, rtol=2e-4), "mismatch vs reference (tiled)"

    print("KERNEL_OK")
</pallas_src>

<mosaic_0001>
module attributes {stable_mosaic.version = 11 : i64} {
  func.func @_emb_kernel(%arg0: i32, %arg1: memref<16x1xf32, #tpu.memory_space<vmem>>, %arg2: memref<16x1xi32, #tpu.memory_space<vmem>>, %arg3: memref<3x128xf32, #tpu.memory_space<vmem>>, %arg4: memref<16x128xf32, #tpu.memory_space<vmem>>) attributes {dimension_semantics = [#tpu.dimension_semantics<parallel>], iteration_bounds = array<i64: 1>, scalar_prefetch = 0 : i64, scratch_operands = 0 : i64, tpu.core_type = #tpu.core_type<tc>, window_params = [{transform_indices = @transform_0, window_bounds = array<i64: 16, 1>}, {transform_indices = @transform_1, window_bounds = array<i64: 16, 1>}, {pipeline_mode = #tpu.pipeline_mode<synchronous>, transform_indices = @transform_2, window_bounds = array<i64: 3, 128>}, {transform_indices = @transform_3, window_bounds = array<i64: 16, 128>}]} {
    %c0 = arith.constant 0 : index
    %c0_0 = arith.constant 0 : index
    %0 = vector.load %arg3[%c0, %c0_0] : memref<3x128xf32, #tpu.memory_space<vmem>>, vector<1x128xf32>
    %c1 = arith.constant 1 : index
    %c0_1 = arith.constant 0 : index
    %1 = vector.load %arg3[%c1, %c0_1] : memref<3x128xf32, #tpu.memory_space<vmem>>, vector<1x128xf32>
    %c2 = arith.constant 2 : index
    %c0_2 = arith.constant 0 : index
    %2 = vector.load %arg3[%c2, %c0_2] : memref<3x128xf32, #tpu.memory_space<vmem>>, vector<1x128xf32>
    %c0_3 = arith.constant 0 : index
    %c0_4 = arith.constant 0 : index
    %3 = vector.load %arg1[%c0_3, %c0_4] : memref<16x1xf32, #tpu.memory_space<vmem>>, vector<16x1xf32>
    %4 = vector.broadcast %3 : vector<16x1xf32> to vector<16x128xf32>
    %5 = vector.broadcast %0 : vector<1x128xf32> to vector<16x128xf32>
    %6 = arith.mulf %4, %5 : vector<16x128xf32>
    %7 = vector.broadcast %1 : vector<1x128xf32> to vector<16x128xf32>
    %8 = arith.addf %6, %7 : vector<16x128xf32>
    %9 = math.sin %8 : vector<16x128xf32>
    %c0_5 = arith.constant 0 : index
    %c0_6 = arith.constant 0 : index
    %10 = vector.load %arg2[%c0_5, %c0_6] : memref<16x1xi32, #tpu.memory_space<vmem>>, vector<16x1xi32>
    %c0_i32 = arith.constant 0 : i32
    %11 = vector.broadcast %c0_i32 : i32 to vector<16x1xi32>
    %12 = arith.cmpi ne, %10, %11 : vector<16x1xi32>
    %13 = vector.shape_cast %12 : vector<16x1xi1> to vector<16x1xi1>
    %14 = vector.broadcast %13 : vector<16x1xi1> to vector<16x128xi1>
    %15 = vector.shape_cast %2 : vector<1x128xf32> to vector<1x128xf32>
    %16 = vector.broadcast %15 : vector<1x128xf32> to vector<16x128xf32>
    %17 = arith.select %14, %16, %9 : vector<16x128xi1>, vector<16x128xf32>
    %c0_7 = arith.constant 0 : index
    %c0_8 = arith.constant 0 : index
    %18 = vector.load %arg4[%c0_7, %c0_8] : memref<16x128xf32, #tpu.memory_space<vmem>>, vector<16x128xf32>
    tpu.vector_store %arg4[%c0_7, %c0_8], %17 {strides = array<i32>} : memref<16x128xf32, #tpu.memory_space<vmem>>, vector<16x128xf32>,
    return
  }
  func.func @transform_0(%arg0: i32) -> (i32, i32) {
    %c0_i32 = arith.constant 0 : i32
    %c0_i32_0 = arith.constant 0 : i32
    return %arg0, %c0_i32 : i32, i32
  }
  func.func @transform_1(%arg0: i32) -> (i32, i32) {
    %c0_i32 = arith.constant 0 : i32
    %c0_i32_0 = arith.constant 0 : i32
    return %arg0, %c0_i32 : i32, i32
  }
  func.func @transform_2(%arg0: i32) -> (i32, i32) {
    %c0_i32 = arith.constant 0 : i32
    %c0_i32_0 = arith.constant 0 : i32
    %c0_i32_1 = arith.constant 0 : i32
    return %c0_i32, %c0_i32_0 : i32, i32
  }
  func.func @transform_3(%arg0: i32) -> (i32, i32) {
    %c0_i32 = arith.constant 0 : i32
    %c0_i32_0 = arith.constant 0 : i32
    return %arg0, %c0_i32 : i32, i32
  }
}

</mosaic_0001>

<bundles_post_ra>
// kernel: tpu_custom_call.1
= control target key start
LH: loop header
LB: loop body
LE: loop exit
PB: predicated region body
PF: predicated region fallthrough
CT: control target
= control target key end

     0   :  { %v351_v2 = vmov 0   ;;  %s482_s0 = inlined_call_operand.vmem [shape: f32[16,1], index: 0, kind: input, shape index: {}]   ;;  %s483_s1 = inlined_call_operand.vmem [shape: s32[16,1], index: 1, kind: input, shape index: {}]   ;;  %s484_s2 = inlined_call_operand.vmem [shape: f32[3,128], index: 2, kind: input, shape index: {}]   ;;  %s485_s3 = inlined_call_operand.hbm [shape: f32[16,128], index: 3, kind: output, shape index: {}]  }
   0x1   :  { %v18_v0 = vld [vmem:[%s482_s0] sm:$0xff]  ;;  %317 = vset.pattern.permute.xlu0 %v351_v2  ;;  %318 = vset.pattern.permute.xlu1 %v351_v2  ;;  %v251_v3 = vld [vmem:[%s483_s1 + $0x8] sm:$0xff] }
   0x2   :  { %v250_v1 = vld [vmem:[%s483_s1] sm:$0xff]  ;;  %22 = vperm.xlu0 %317, %v18_v0   ;;  %vm253_vm1 = vcmp.ne.s32.totalorder %v251_v3, 0  ;;  %v19_v5 = vld [vmem:[%s482_s0 + $0x8] sm:$0xff] }
   0x3   :  { %vm252_vm0 = vcmp.ne.s32.totalorder %v250_v1, 0  ;;  %v255_v6 = vsel %vm253_vm1, 1, %v351_v2 }
   0x4   :  { %v254_v4 = vsel %vm252_vm0, 1, %v351_v2 }
   0x5   :  { %257 = vperm.xlu1 %318, %v254_v4  }
   0x6   :  { %8 = vsyncpa [#allocation3], 0  ;;  %27 = vperm.xlu0 %317, %v19_v5   ;;  %v288_v7 = vld [vmem:[%s484_s2] ss:$0 sm:$0xff]  ;;  %v289_v9 = vld [vmem:[%s484_s2 + $0x1] ss:$0 sm:$0xff] }
   0x7   :  { %v352_v31 = vmov 683565275   ;;  %v353_v35 = vmov 2475754826   ;;  %v354_v37 = vmov 2131351028  }
   0x8   :  { %v355_v39 = vmov 2102212464   ;;  %v356_v41 = vmov 920167782   ;;  %v357_v48 = vmov 1326507024  }
   0x9   :  { %260 = vperm.xlu1 %318, %v255_v6  }
  0x81   :  { %v23_v8 = vpop.permute.xlu0 %22 }
  0x82   :  { %v34_v10 = vmul.f32 %v288_v7, %v23_v8 }
  0x84   :  { %v399_v11 = vadd.f32 %v289_v9, %v34_v10 }
  0x85   :  { %v28_v12 = vpop.permute.xlu0 %27 }
  0x86   :  { %v42_v13 = vand.u32 2147483647, %v399_v11  ;;  %v45_v14 = vand.u32 2139095040, %v399_v11  ;;  %v35_v15 = vmul.f32 %v288_v7, %v28_v12  ;;  %vm44_vm0 = vcmp.lt.s32.totalorder %v399_v11, 0 }
  0x88   :  { %v46_v16 = vshrl.u32 %v45_v14, 23  ;;  %v403_v17 = vadd.f32 %v289_v9, %v35_v15  ;;  %v49_v18 = vand.u32 8388607, %v42_v13  ;;  %vm43_vm1 = vcmp.le.f32.partialorder %v42_v13, 0.7853982 }
  0x8a   :  { %v290_v19 = vadd.s32 4294967169, %v46_v16  ;;  %v149_v20 = vand.u32 2139095040, %v403_v17  ;;  %v50_v22 = vor.u32 8388608, %v49_v18  ;;  %v146_v24 = vand.u32 2147483647, %v403_v17 }
  0x8c   :  { %v52_v21 = vadd.s32 1, %v290_v19  ;;  %v150_v23 = vshrl.u32 %v149_v20, 23  ;;  %v409_v29 = vshll.u32 %v50_v22, 8  ;;  %v153_v33 = vand.u32 8388607, %v146_v24 }
  0x8e   :  { %vm53_vm2 = vcmp.gt.s32.totalorder %v52_v21, 0  ;;  %v294_v26 = vadd.s32 4294967169, %v150_v23  ;;  %v154_v63 = vor.u32 8388608, %v153_v33 }
  0x8f   :  { %v54_v25 = vsel %vm53_vm2, %v52_v21, 0  ;;  %vm148_vm2 = vcmp.lt.s32.totalorder %v403_v17, 0 }
  0x90   :  { %v55_v27 = vshrl.u32 %v54_v25, 5  ;;  %v56_v28 = vand.u32 31, %v54_v25  ;;  %v156_v34 = vadd.s32 1, %v294_v26  ;;  %v194_v14 = vshll.u32 %v154_v63, 8 }
  0x92   :  { %v57_v30 = vsub.s32 32, %v56_v28  ;;  %v59_v32 = vshll.u32 %v352_v31, %v56_v28  ;;  %v62_v36 = vshll.u32 %v353_v35, %v56_v28  ;;  %v65_v38 = vshll.u32 %v354_v37, %v56_v28 }
  0x93   :  { %v68_v40 = vshll.u32 %v355_v39, %v56_v28  ;;  %v71_v42 = vshll.u32 %v356_v41, %v56_v28  ;;  %vm74_vm3 = vcmp.lt.s32.totalorder %v55_v27, 1  ;;  %vm76_vm4 = vcmp.lt.s32.totalorder %v55_v27, 3 }
  0x94   :  { %v60_v43 = vshrl.u32 %v353_v35, %v57_v30  ;;  %v63_v44 = vshrl.u32 %v354_v37, %v57_v30  ;;  %v66_v45 = vshrl.u32 %v355_v39, %v57_v30  ;;  %v58_v46 = vshrl.u32 %v352_v31, %v57_v30 }
  0x95   :  { %v69_v47 = vshrl.u32 %v356_v41, %v57_v30  ;;  %v72_v49 = vshrl.u32 %v357_v48, %v57_v30  ;;  %vm157_vm5 = vcmp.gt.s32.totalorder %v156_v34, 0  ;;  %vm77_vm6 = vcmp.lt.s32.totalorder %v55_v27, 4 }
  0x96   :  { %v61_v50 = vor.u32 %v60_v43, %v59_v32  ;;  %v64_v51 = vor.u32 %v63_v44, %v62_v36  ;;  %v67_v52 = vor.u32 %v66_v45, %v65_v38  ;;  %v158_v55 = vsel %vm157_vm5, %v156_v34, 0 }
  0x97   :  { %v70_v53 = vor.u32 %v69_v47, %v68_v40  ;;  %v73_v54 = vor.u32 %v72_v49, %v71_v42  ;;  %vm75_vm7 = vcmp.lt.s32.totalorder %v55_v27, 2  ;;  %v160_v2 = vand.u32 31, %v158_v55 }
  0x98   :  { %v78_v56 = vsel %vm74_vm3, %v58_v46, %v61_v50  ;;  %v79_v57 = vsel %vm77_vm6, %v67_v52, 2102212464  ;;  %v82_v58 = vsel %vm74_vm3, %v61_v50, %v64_v51  ;;  %v86_v59 = vsel %vm74_vm3, %v64_v51, %v67_v52 }
  0x99   :  { %v80_v60 = vsel %vm76_vm4, %v64_v51, %v79_v57  ;;  %v83_v61 = vsel %vm77_vm6, %v70_v53, 920167782  ;;  %v87_v62 = vsel %vm77_vm6, %v73_v54, 1326507024  ;;  %v159_v10 = vshrl.u32 %v158_v55, 5 }
  0x9a   :  { %v84_v0 = vsel %vm76_vm4, %v67_v52, %v83_v61  ;;  %v88_v1 = vsel %vm76_vm4, %v70_v53, %v87_v62  ;;  %v81_v3 = vsel %vm75_vm7, %v78_v56, %v80_v60  ;;  %v161_v12 = vsub.s32 32, %v160_v2 }
  0x9b   :  { %v85_v4 = vsel %vm75_vm7, %v82_v58, %v84_v0  ;;  %v89_v5 = vsel %vm75_vm7, %v86_v59, %v88_v1  ;;  %v97_v15 = vmul.u32 %v409_v29, %v81_v3  ;;  %v163_v16 = vshll.u32 %v352_v31, %v160_v2 }
  0x9c   :  { %v422_v6 = vmul.u32.u64.low %v409_v29, %v89_v5  ;;  %v423_v7 = vmul.u32.u64.high %v409_v29, %v89_v5, %v422_v6  ;;  %v426_v8 = vmul.u32.u64.low %v409_v29, %v85_v4  ;;  %v427_v9 = vmul.u32.u64.high %v409_v29, %v85_v4, %v426_v8 }
  0x9d   :  { %v166_v18 = vshll.u32 %v353_v35, %v160_v2  ;;  %v169_v19 = vshll.u32 %v354_v37, %v160_v2  ;;  %v164_v20 = vshrl.u32 %v353_v35, %v161_v12  ;;  %v167_v21 = vshrl.u32 %v354_v37, %v161_v12 }
  0x9e   :  { %v170_v22 = vshrl.u32 %v355_v39, %v161_v12  ;;  %v172_v23 = vshll.u32 %v355_v39, %v160_v2  ;;  %vm99_vm8 = vc.u32 %v423_v7, %v426_v8  ;;  %v100_v25 = vadd.s32 1, %v427_v9 }
  0x9f   :  { %v173_v26 = vshrl.u32 %v356_v41, %v161_v12  ;;  %v175_v27 = vshll.u32 %v356_v41, %v160_v2  ;;  %v165_v28 = vor.u32 %v164_v20, %v163_v16  ;;  %v168_v30 = vor.u32 %v167_v21, %v166_v18 }
  0xa0   :  { %v171_v32 = vor.u32 %v170_v22, %v169_v19  ;;  %v176_v33 = vshrl.u32 %v357_v48, %v161_v12  ;;  %v101_v29 = vsel %vm99_vm8, %v100_v25, %v427_v9  ;;  %vm178_vm9 = vcmp.lt.s32.totalorder %v159_v10, 1 }
  0xa1   :  { %v174_v34 = vor.u32 %v173_v26, %v172_v23  ;;  %vm181_vm10 = vcmp.lt.s32.totalorder %v159_v10, 4  ;;  %v102_v35 = vadd.s32 %v101_v29, %v97_v15  ;;  %vm180_vm11 = vcmp.lt.s32.totalorder %v159_v10, 3 }
  0xa2   :  { %v177_v36 = vor.u32 %v176_v33, %v175_v27  ;;  %v183_v37 = vsel %vm181_vm10, %v171_v32, 2102212464  ;;  %v162_v38 = vshrl.u32 %v352_v31, %v161_v12  ;;  %v186_v39 = vsel %vm178_vm9, %v165_v28, %v168_v30 }
  0xa3   :  { %v187_v40 = vsel %vm181_vm10, %v174_v34, 920167782  ;;  %v190_v42 = vsel %vm178_vm9, %v168_v30, %v171_v32  ;;  %v103_v43 = vadd.s32 536870912, %v102_v35  ;;  %vm179_vm12 = vcmp.lt.s32.totalorder %v159_v10, 2 }
  0xa4   :  { %v188_v41 = vsel %vm180_vm11, %v171_v32, %v187_v40  ;;  %v191_v44 = vsel %vm181_vm10, %v177_v36, 1326507024  ;;  %v182_v45 = vsel %vm178_vm9, %v162_v38, %v165_v28  ;;  %v184_v46 = vsel %vm180_vm11, %v168_v30, %v183_v37 }
  0xa5   :  { %v189_v47 = vsel %vm179_vm12, %v186_v39, %v188_v41  ;;  %v192_v48 = vsel %vm180_vm11, %v174_v34, %v191_v44  ;;  %v104_v49 = vshrl.u32 %v103_v43, 30  ;;  %v185_v55 = vsel %vm179_vm12, %v182_v45, %v184_v46 }
  0xa6   :  { %v193_v50 = vsel %vm179_vm12, %v190_v42, %v192_v48  ;;  %v437_v51 = vmul.u32.u64.low %v194_v14, %v189_v47  ;;  %v438_v52 = vmul.u32.u64.high %v194_v14, %v189_v47, %v437_v51  ;;  %v201_v58 = vmul.u32 %v194_v14, %v185_v55 }
  0xa7   :  { %v440_v53 = vmul.u32.u64.low %v194_v14, %v193_v50  ;;  %v441_v54 = vmul.u32.u64.high %v194_v14, %v193_v50, %v440_v53  ;;  %v105_v31 = vshll.u32 %v104_v49, 30  ;;  %v98_v6 = vadd.s32 %v426_v8, %v423_v7 }
  0xa8   :  { %v204_v57 = vadd.s32 1, %v438_v52  ;;  %v128_v30 = vsub.s32 4, %v104_v49  ;;  %vm456_vm3 = vcmp.le.f32.partialorder %v146_v24, 0.7853982  ;;  %vm134_vm8 = vweird.f32 %v399_v11 }
  0xa9   :  { %v106_v56 = vsub.s32 %v102_v35, %v105_v31  ;;  %vm203_vm13 = vc.u32 %v441_v54, %v437_v51  ;;  %v202_v7 = vadd.s32 %v437_v51, %v441_v54  ;;  %vm238_vm12 = vweird.f32 %v403_v17 }
  0xaa   :  { %v205_v60 = vsel %vm203_vm13, %v204_v57, %v438_v52  ;;  %v129_v37 = vsel %vm44_vm0, %v128_v30, %v104_v49  ;;  %v258_v57 = vpop.permute.xlu1 %257 }
  0xab   :  { %v108_v59 = vsub.s32 0, %v106_v56  ;;  %v206_v61 = vadd.s32 %v205_v60, %v201_v58  ;;  %v131_v43 = vsel %vm43_vm1, 0, %v129_v37  ;;  %v298_v58 = vld [vmem:[%s484_s2 + $0x2] ss:$0 sm:$0xff]  ;;  %vm262_vm7 = vcmp.eq.s32.totalorder %v258_v57, 1  ;;  %s358_s2 = smov [#allocation2]  }
  0xac   :  { %v135_v45 = vadd.s32 3, %v131_v43  ;;  %s277_s24 = sshll.u32 %s358_s2, 4  ;;  %s278_s24 = int_to_ptr.vmem [resolvable:$true] %s277_s24 }
  0xad   :  { %v291_v62 = vmin.u32 %v108_v59, %v106_v56  ;;  %v207_v63 = vadd.s32 536870912, %v206_v61  ;;  %s327_s25 = scalar_lea.vmem %s278_s24, 256  ;;  %p332_p1 = scmp.lt.s32.totalorder %s278_s24, %s278_s24 }
  0xae   :  { %v136_v50 = vand.u32 3, %v135_v45  ;;  %p328_p0 = scmp.ne.s32.totalorder %s278_s24, %s327_s25  ;;  %p333_p2 = scmp.lt.s32.totalorder %s327_s25, %s327_s25 }
  0xaf   :  { %v110_v0 = vclz %v291_v62  ;;  %v208_v1 = vshrl.u32 %v207_v63, 30 }
  0xb0   :  { %vm141_vm4 = vcmp.eq.s32.totalorder %v136_v50, 2  ;;  %vm138_vm5 = vcmp.eq.s32.totalorder %v136_v50, 0  ;;  %vm137_vm6 = vcmp.lt.s32.totalorder %v136_v50, 2  ;;  %p334_p3 = por %p333_p2, %p332_p1 }
  0xb1   :  { %v292_v2 = vadd.s32 4294967294, %v110_v0  ;;  %v209_v3 = vshll.u32 %v208_v1, 30  ;;  %v232_v47 = vsub.s32 4, %v208_v1 }
  0xb2   :  { %p335_p4 = pnand %p334_p3, %p328_p0 }
  0xb3   :  { %vm293_vm14 = vcmp.lt.s32.totalorder %v292_v2, 0  ;;  %v210_v5 = vsub.s32 %v206_v61, %v209_v3  ;;  %v233_v49 = vsel %vm148_vm2, %v232_v47, %v208_v1 }
  0xb4   :  { %v113_v4 = vsel %vm293_vm14, 0, %v292_v2 }
  0xb5   :  { %v114_v9 = vsub.s32 32, %v113_v4  ;;  %v118_v10 = vsub.s32 4294967266, %v113_v4  ;;  %v212_v12 = vsub.s32 0, %v210_v5  ;;  %v115_v14 = vshll.u32 %v106_v56, %v113_v4 }
  0xb6   :  { %v235_v56 = vsel %vm456_vm3, 0, %v233_v49 }
  0xb7   :  { %v116_v15 = vshrl.u32 %v98_v6, %v114_v9  ;;  %v119_v16 = vadd.s32 127, %v118_v10  ;;  %v295_v18 = vmin.u32 %v212_v12, %v210_v5  ;;  %v239_v61 = vadd.s32 3, %v235_v56 }
  0xb9   :  { %v117_v19 = vor.u32 %v116_v15, %v115_v14  ;;  %v120_v20 = vshll.u32 %v119_v16, 23  ;;  %v214_v21 = vclz %v295_v18  ;;  %v240_v0 = vand.u32 3, %v239_v61 }
  0xbb   :  { %v121_v22 = vor.u32 4788187, %v120_v20  ;;  %v296_v23 = vadd.s32 4294967294, %v214_v21  ;;  %v124_v26 = vcvt.s32.f32 %v117_v19  ;;  %vm245_vm9 = vcmp.eq.s32.totalorder %v240_v0, 2 }
  0xbc   :  { %vm242_vm10 = vcmp.eq.s32.totalorder %v240_v0, 0  ;;  %vm241_vm11 = vcmp.lt.s32.totalorder %v240_v0, 2 }
  0xbd   :  { %v122_v25 = vand.u32 2147483647, %v121_v22  ;;  %vm297_vm15 = vcmp.lt.s32.totalorder %v296_v23, 0 }
  0xbe   :  { %v217_v28 = vsel %vm297_vm15, 0, %v296_v23 }
  0xbf   :  { %v125_v27 = vmul.f32 %v124_v26, %v122_v25  ;;  %v218_v8 = vsub.s32 32, %v217_v28  ;;  %v222_v32 = vsub.s32 4294967266, %v217_v28  ;;  %v219_v29 = vshll.u32 %v210_v5, %v217_v28  ;;  %v261_v5 = vpop.permute.xlu1 %260 }
  0xc0   :  { %vm263_vm13 = vcmp.eq.s32.totalorder %v261_v5, 1 }
  0xc1   :  { %v126_v33 = vxor.u32 2147483648, %v125_v27  ;;  %v220_v34 = vshrl.u32 %v202_v7, %v218_v8  ;;  %v223_v35 = vadd.s32 127, %v222_v32 }
  0xc3   :  { %v127_v36 = vsel %vm44_vm0, %v126_v33, %v125_v27  ;;  %v221_v38 = vor.u32 %v220_v34, %v219_v29  ;;  %v224_v39 = vshll.u32 %v223_v35, 23 }
  0xc4   :  { %v130_v40 = vsel %vm43_vm1, %v399_v11, %v127_v36 }
  0xc5   :  { %319 = vcosq.f32 %v130_v40  ;;  %v225_v42 = vor.u32 4788187, %v224_v39  ;;  %v228_v44 = vcvt.s32.f32 %v221_v38 }
  0xc6   :  { %321 = vsinq.f32 %v130_v40 }
  0xc7   :  { %v226_v41 = vand.u32 2147483647, %v225_v42 }
  0xc9   :  { %v229_v46 = vmul.f32 %v228_v44, %v226_v41 }
  0xcb   :  { %v230_v48 = vxor.u32 2147483648, %v229_v46 }
  0xcd   :  { %v231_v51 = vsel %vm148_vm2, %v230_v48, %v229_v46 }
  0xce   :  { %v234_v53 = vsel %vm456_vm3, %v403_v17, %v231_v51 }
  0xcf   :  { %v320_v52 = vpop.eup %319  ;;  %323 = vcosq.f32 %v234_v53 }
  0xd0   :  { %v322_v54 = vpop.eup %321  ;;  %v142_v31 = vxor.u32 2147483648, %v320_v52  ;;  %325 = vsinq.f32 %v234_v53 }
  0xd1   :  { %v139_v55 = vxor.u32 2147483648, %v322_v54 }
  0xd2   :  { %v143_v24 = vsel %vm141_vm4, %v142_v31, %v322_v54 }
  0xd3   :  { %v140_v59 = vsel %vm138_vm5, %v320_v52, %v139_v55 }
  0xd4   :  { %v144_v60 = vsel %vm137_vm6, %v140_v59, %v143_v24 }
  0xd5   :  { %v145_v62 = vsel %vm134_vm8, nan, %v144_v60 }
  0xd6   :  { %v268_v63 = vsel %vm262_vm7, %v298_v58, %v145_v62 }
  0xd7   :  { %270 = vst [vmem:[#allocation2] sm:$0xff] %v268_v63 }
  0xd9   :  { %v324_v1 = vpop.eup %323 }
  0xda   :  { %v326_v2 = vpop.eup %325  ;;  %v246_v3 = vxor.u32 2147483648, %v324_v1 }
  0xdb   :  { %v243_v4 = vxor.u32 2147483648, %v326_v2 }
  0xdc   :  { %v247_v6 = vsel %vm245_vm9, %v246_v3, %v326_v2 }
  0xdd   :  { %v244_v9 = vsel %vm242_vm10, %v324_v1, %v243_v4 }
  0xde   :  { %v248_v11 = vsel %vm241_vm11, %v244_v9, %v247_v6 }
  0xdf   :  { %v249_v10 = vsel %vm238_vm12, nan, %v248_v11 }
  0xe0   :  { %v269_v12 = vsel %vm263_vm13, %v298_v58, %v249_v10 }
  0xe1   :  { %271 = vst [vmem:[#allocation2 + $0x8] sm:$0xff] %v269_v12 }
  0xe2   :  { %338 = shalt.err (!%p335_p4)
}
  0xe3   :  { %s339_s28 = scalar_lea.hbm %s485_s3, 256 }
  0xe4   :  { %p340_p5 = scmp.ne.s32.totalorder %s485_s3, %s339_s28  ;;  %p343_p6 = scmp.lt.u32.totalorder %s339_s28, %s485_s3 }
  0xe6   :  { %p345_p7 = pnand %p343_p6, %p340_p5 }
  0xe8   :  { %348 = shalt.err (!%p345_p7)
}
  0xe9   :  { %s359_s6 = smov 128   ;;  %s360_s7 = smov 8  }
  0xea   :  { %283 = dma.vmem_to_hbm [thread:$0]  %s278_s24, 256, %s485_s3, [#allocation3], %s359_s6, %s359_s6, %s360_s7  }
  0xeb   :  { %349 = dma.done.wait [#allocation3], 256  }
  0xec   :  { %350 = vsyncadd [#allocation3], 4294967040 }
  0xed   :  { %287 = vsyncpa [#allocation3], 1 }

</bundles_post_ra>
